<compile_context>
chip_gen: v6e
topology: v6e:2x2x1
jax: 0.10.0
libtpu: 0.0.40
codegen_flags: <defaults>
</compile_context>

<pallas_src>
import functools
import numpy as np
import jax
import jax.numpy as jnp
from jax.experimental import pallas as pl
from jax.experimental.pallas import tpu as pltpu


def _round_up(x, m):
    return (x + m - 1) // m * m


# --------------------------------------------------------------------------- #
# Anchor utilities (pure glue, NumPy — same role as utils in the PyTorch repo) #
# --------------------------------------------------------------------------- #
def generate_anchor_base(base_size=16, ratios=(0.5, 1, 2), anchor_scales=(8, 16, 32)):
    n = len(ratios) * len(anchor_scales)
    anchor_base = np.zeros((n, 4), dtype=np.float32)
    for i, r in enumerate(ratios):
        for j, s in enumerate(anchor_scales):
            h = base_size * s * np.sqrt(r)
            w = base_size * s * np.sqrt(1.0 / r)
            idx = i * len(anchor_scales) + j
            anchor_base[idx, 0] = -w / 2.0
            anchor_base[idx, 1] = -h / 2.0
            anchor_base[idx, 2] = w / 2.0
            anchor_base[idx, 3] = h / 2.0
    return anchor_base


def _enumerate_shifted_anchor(anchor_base, feat_stride, height, width):
    shift_x = np.arange(0, width * feat_stride, feat_stride)
    shift_y = np.arange(0, height * feat_stride, feat_stride)
    shift_x, shift_y = np.meshgrid(shift_x, shift_y)
    shift = np.stack((shift_x.ravel(), shift_y.ravel(),
                      shift_x.ravel(), shift_y.ravel()), axis=1)
    A = anchor_base.shape[0]
    K = shift.shape[0]
    anchor = anchor_base.reshape((1, A, 4)) + shift.reshape((K, 1, 4))
    return anchor.reshape((K * A, 4)).astype(np.float32)


def loc2bbox(src_bbox, loc):
    w = src_bbox[:, 2] - src_bbox[:, 0]
    h = src_bbox[:, 3] - src_bbox[:, 1]
    cx = src_bbox[:, 0] + 0.5 * w
    cy = src_bbox[:, 1] + 0.5 * h
    dx, dy, dw, dh = loc[:, 0], loc[:, 1], loc[:, 2], loc[:, 3]
    ncx = dx * w + cx
    ncy = dy * h + cy
    nw = np.exp(dw) * w
    nh = np.exp(dh) * h
    return np.stack([ncx - 0.5 * nw, ncy - 0.5 * nh,
                     ncx + 0.5 * nw, ncy + 0.5 * nh], axis=1)


def nms_numpy(boxes, scores, thresh):
    if boxes.shape[0] == 0:
        return np.zeros((0,), np.int64)
    x1, y1, x2, y2 = boxes[:, 0], boxes[:, 1], boxes[:, 2], boxes[:, 3]
    areas = (x2 - x1) * (y2 - y1)
    order = np.argsort(-scores)
    keep = []
    while order.size > 0:
        i = order[0]
        keep.append(i)
        xx1 = np.maximum(x1[i], x1[order[1:]])
        yy1 = np.maximum(y1[i], y1[order[1:]])
        xx2 = np.minimum(x2[i], x2[order[1:]])
        yy2 = np.minimum(y2[i], y2[order[1:]])
        w = np.maximum(0.0, xx2 - xx1)
        h = np.maximum(0.0, yy2 - yy1)
        inter = w * h
        iou = inter / (areas[i] + areas[order[1:]] - inter + 1e-12)
        order = order[np.where(iou <= thresh)[0] + 1]
    return np.asarray(keep, np.int64)


class ProposalCreator:
    # TODO(synk): NMS / argsort / boolean indexing have dynamic output shapes and
    # no clean Pallas equivalent; kept host-side (NumPy), faithful to semantics.
    def __init__(self, mode, nms_thresh=0.7, n_train_pre_nms=12000,
                 n_train_post_nms=600, n_test_pre_nms=3000, n_test_post_nms=300,
                 min_size=16):
        self.mode = mode
        self.nms_thresh = nms_thresh
        self.n_train_pre_nms = n_train_pre_nms
        self.n_train_post_nms = n_train_post_nms
        self.n_test_pre_nms = n_test_pre_nms
        self.n_test_post_nms = n_test_post_nms
        self.min_size = min_size

    def __call__(self, loc, score, anchor, img_size, scale=1.0):
        if self.mode == "training":
            n_pre_nms, n_post_nms = self.n_train_pre_nms, self.n_train_post_nms
        else:
            n_pre_nms, n_post_nms = self.n_test_pre_nms, self.n_test_post_nms
        roi = loc2bbox(anchor, loc)
        roi[:, [0, 2]] = np.clip(roi[:, [0, 2]], 0, img_size[1])
        roi[:, [1, 3]] = np.clip(roi[:, [1, 3]], 0, img_size[0])
        min_size = self.min_size * scale
        keep = np.where((roi[:, 2] - roi[:, 0] >= min_size) &
                        (roi[:, 3] - roi[:, 1] >= min_size))[0]
        roi, score = roi[keep, :], score[keep]
        order = np.argsort(-score)
        if n_pre_nms > 0:
            order = order[:n_pre_nms]
        roi, score = roi[order, :], score[order]
        keep = nms_numpy(roi, score, self.nms_thresh)
        keep = keep[:n_post_nms]
        return roi[keep]


# --------------------------------------------------------------------------- #
# Pallas kernel: fused im2col-conv3x3 + ReLU + fused score/loc 1x1 + fg prob   #
# --------------------------------------------------------------------------- #
def _rpn_head_kernel(n_anchor, patches_ref, w1_ref, b1_ref, wh_ref, bh_ref,
                     out_ref):
    A = n_anchor
    # patches_ref: (1, TILE_M, 9*CinP) bf16   im2col rows for this spatial tile
    # w1_ref:      (9*CinP, CmidP)     bf16   packed 3x3 conv weight
    # wh_ref:      (CmidP, OUT_LANES)  bf16   fused [score(bg|fg) | loc | 0] weight
    slab = patches_ref[0]                                          # bf16

    # conv1 (single long-K MXU contraction) + bias + ReLU, f32 accumulation
    hidden = jnp.dot(slab, w1_ref[...], preferred_element_type=jnp.float32)
    hidden = jnp.maximum(hidden + b1_ref[...], 0.0)

    # fused score + loc 1x1 convs -> one lane-dense (TILE_M, OUT_LANES) slab
    out = jnp.dot(hidden.astype(jnp.bfloat16), wh_ref[...],
                  preferred_element_type=jnp.float32) + bh_ref[...]

    # fg prob = softmax((bg, fg))[fg] = sigmoid(s_fg - s_bg); bg in lanes [0,A),
    # fg in lanes [A,2A) (channels reordered at weight-packing time) -> no matmul,
    # just VPU subtract + EUP exp + approx reciprocal.
    d = out[:, A:2 * A] - out[:, :A]
    fg = pl.reciprocal(1.0 + jnp.exp(-d), approx=True)

    out_ref[0] = out                       # full-lane (unmasked) store
    out_ref[0, :, 6 * A:7 * A] = fg        # pack fg probs into unused lanes


@functools.partial(jax.jit, static_argnames=("n_anchor",))
def _rpn_head(x_nchw, w1, b1, whead, bhead, *, n_anchor):
    """Returns (rpn_locs (N,HW*A,4) f32, rpn_scores (N,HW*A,2) f32, fg (N,HW*A) f32)."""
    N, Cin, H, W = x_nchw.shape
    K, CmidP = w1.shape
    CinP = K // 9
    OUT_LANES = whead.shape[1]
    A = n_anchor
    HW = H * W

    # TODO(synk): ideally the backbone emits NHWC and the halo/pad/im2col is done
    # via in-kernel DMA to avoid this extra HBM pass; kept in XLA for simplicity.
    x = jnp.transpose(x_nchw, (0, 2, 3, 1)).astype(jnp.bfloat16)
    xp = jnp.pad(x, ((0, 0), (1, 1), (1, 1), (0, CinP - Cin)))     # conv pad + lane pad

    # im2col: (N, HW, 9*CinP), column block k = ky*3+kx holds xp[:, h+ky, w+kx, :]
    taps = [xp[:, ky:ky + H, kx:kx + W, :] for ky in range(3) for kx in range(3)]
    patches = jnp.concatenate(taps, axis=-1).reshape(N, HW, K)

    # spatial row tiling (bounds per-step VMEM, gives pipeline depth / megacore axis)
    TILE_M = min(256, _round_up(HW, 16))
    M_pad = _round_up(HW, TILE_M)
    if M_pad != HW:
        patches = jnp.pad(patches, ((0, 0), (0, M_pad - HW), (0, 0)))

    # explicit VMEM budget (double-buffered inputs/outputs + headroom)
    est = 2 * (TILE_M * K * 2 + K * CmidP * 2 + CmidP * OUT_LANES * 2
               + TILE_M * OUT_LANES * 4 + CmidP * 4 + OUT_LANES * 4)
    est += 2 * TILE_M * CmidP * 4                     # live 'hidden' intermediate
    vmem_limit = int(min(max(2 * est + (8 << 20), 16 << 20), 48 << 20))

    grid_spec = pltpu.PrefetchScalarGridSpec(
        num_scalar_prefetch=0,
        grid=(N, M_pad // TILE_M),
        in_specs=[
            pl.BlockSpec((1, TILE_M, K), lambda b, t: (b, t, 0)),
            pl.BlockSpec((K, CmidP), lambda b, t: (0, 0)),        # resident weights
            pl.BlockSpec((1, CmidP), lambda b, t: (0, 0)),
            pl.BlockSpec((CmidP, OUT_LANES), lambda b, t: (0, 0)),
            pl.BlockSpec((1, OUT_LANES), lambda b, t: (0, 0)),
        ],
        out_specs=pl.BlockSpec((1, TILE_M, OUT_LANES), lambda b, t: (b, t, 0)),
    )
    slab = pl.pallas_call(
        functools.partial(_rpn_head_kernel, A),
        out_shape=jax.ShapeDtypeStruct((N, M_pad, OUT_LANES), jnp.float32),
        grid_spec=grid_spec,
        compiler_params=pltpu.CompilerParams(
            dimension_semantics=("parallel", "parallel"),
            vmem_limit_bytes=vmem_limit),
    )(patches, w1, b1, whead, bhead)

    slab = slab[:, :HW, :]
    bg = slab[..., :A]
    fg_logit = slab[..., A:2 * A]
    # rebuild PyTorch's interleaved (bg, fg) pairs: row p*A + a -> (bg_a, fg_a)
    rpn_scores = jnp.stack([bg, fg_logit], axis=-1).reshape(N, HW * A, 2)
    rpn_locs = slab[..., 2 * A:6 * A].reshape(N, HW * A, 4)
    rpn_fg = slab[..., 6 * A:7 * A].reshape(N, HW * A)
    return rpn_locs, rpn_scores, rpn_fg


# --------------------------------------------------------------------------- #
# Module wrapper (parameter init + forward)                                    #
# --------------------------------------------------------------------------- #
class RegionProposalNetworkPallas:
    def __init__(self, in_channels=512, mid_channels=512, ratios=(0.5, 1, 2),
                 anchor_scales=(8, 16, 32), feat_stride=16, mode="training",
                 key=None):
        self.anchor_base = generate_anchor_base(anchor_scales=anchor_scales,
                                                ratios=ratios)
        self.feat_stride = feat_stride
        self.proposal_layer = ProposalCreator(mode)
        A = self.anchor_base.shape[0]
        self.n_anchor = A

        if key is None:
            key = jax.random.PRNGKey(0)
        k1, k2, k3 = jax.random.split(key, 3)
        # normal_init(m, 0, 0.01): weight ~ N(0, 0.01), bias = 0
        w_conv1 = jax.random.normal(k1, (mid_channels, in_channels, 3, 3),
                                    jnp.float32) * 0.01
        w_score = jax.random.normal(k2, (A * 2, mid_channels, 1, 1),
                                    jnp.float32) * 0.01
        w_loc = jax.random.normal(k3, (A * 4, mid_channels, 1, 1),
                                  jnp.float32) * 0.01
        # keep f32 originals around for reference validation
        self._w_conv1, self._w_score, self._w_loc = w_conv1, w_score, w_loc

        # channel padding to lane multiples (wide MXU contractions, aligned DMA)
        CinP = _round_up(in_channels, 128)
        CmidP = _round_up(mid_channels, 128)
        OUT_LANES = _round_up(max(7 * A, 128), 128)
        assert 7 * A <= OUT_LANES
        self._CinP, self._CmidP, self._OUT_LANES = CinP, CmidP, OUT_LANES

        # --- pack conv1 weight for im2col: (9*CinP, CmidP), bf16 -------------
        w1p = np.zeros((9 * CinP, CmidP), np.float32)
        wc = np.asarray(w_conv1)                       # (Cmid, Cin, 3, 3)
        for ky in range(3):
            for kx in range(3):
                k = ky * 3 + kx
                w1p[k * CinP:k * CinP + in_channels, :mid_channels] = wc[:, :, ky, kx].T
        self.w1 = jnp.asarray(w1p, jnp.bfloat16)
        self.b1 = jnp.zeros((1, CmidP), jnp.float32)

        # --- fused score+loc head weight: (CmidP, OUT_LANES), bf16 -----------
        # lanes [0,A)    : bg score logits   (reordered from PyTorch channel 2a)
        # lanes [A,2A)   : fg score logits   (from channel 2a+1)
        # lanes [2A,6A)  : loc deltas        (original channel order a*4+coord)
        # lanes [6A,7A)  : fg probability written by the kernel
        ws = np.asarray(w_score).reshape(2 * A, mid_channels)
        wl = np.asarray(w_loc).reshape(4 * A, mid_channels)
        whead = np.zeros((CmidP, OUT_LANES), np.float32)
        for a in range(A):
            whead[:mid_channels, a] = ws[2 * a]
            whead[:mid_channels, A + a] = ws[2 * a + 1]
        whead[:mid_channels, 2 * A:6 * A] = wl.T
        self.whead = jnp.asarray(whead, jnp.bfloat16)
        self.bhead = jnp.zeros((1, OUT_LANES), jnp.float32)

    def forward(self, x, img_size, scale=1.0):
        n, _, h, w = x.shape
        rpn_locs, rpn_scores, rpn_fg_scores = _rpn_head(
            x, self.w1, self.b1, self.whead, self.bhead, n_anchor=self.n_anchor)

        anchor = _enumerate_shifted_anchor(np.array(self.anchor_base),
                                           self.feat_stride, h, w)

        locs_np = np.asarray(rpn_locs)
        fg_np = np.asarray(rpn_fg_scores)
        rois, roi_indices = [], []
        for i in range(n):
            roi = self.proposal_layer(locs_np[i], fg_np[i], anchor, img_size,
                                      scale=scale)
            rois.append(roi)
            roi_indices.append(np.full((roi.shape[0],), i, np.float32))
        rois = jnp.asarray(np.concatenate(rois, axis=0))
        roi_indices = jnp.asarray(np.concatenate(roi_indices, axis=0))
        return rpn_locs, rpn_scores, rois, roi_indices, anchor


# --------------------------------------------------------------------------- #
# Pure-XLA f32 reference of the head (for validation only)                     #
# --------------------------------------------------------------------------- #
def _reference_head(x, w_conv1, w_score, w_loc):
    dn = ("NCHW", "OIHW", "NCHW")
    h = jax.lax.conv_general_dilated(x, w_conv1, (1, 1), "SAME",
                                     dimension_numbers=dn)
    h = jnp.maximum(h, 0.0)
    s = jax.lax.conv_general_dilated(h, w_score, (1, 1), "VALID",
                                     dimension_numbers=dn)
    l = jax.lax.conv_general_dilated(h, w_loc, (1, 1), "VALID",
                                     dimension_numbers=dn)
    n = x.shape[0]
    rpn_scores = jnp.transpose(s, (0, 2, 3, 1)).reshape(n, -1, 2)
    rpn_locs = jnp.transpose(l, (0, 2, 3, 1)).reshape(n, -1, 4)
    return rpn_locs, rpn_scores


# --------------------------------------------------------------------------- #
if __name__ == "__main__":
    key = jax.random.PRNGKey(0)
    kx_, kp_ = jax.random.split(key)

    N, Cin, Cmid, H, W = 2, 32, 32, 8, 8          # small shapes for the demo
    feat_stride = 16
    x = jax.random.normal(kx_, (N, Cin, H, W), jnp.float32)
    img_size = (H * feat_stride, W * feat_stride)  # (height, width)

    rpn = RegionProposalNetworkPallas(in_channels=Cin, mid_channels=Cmid,
                                      feat_stride=feat_stride, mode="training",
                                      key=kp_)
    rpn_locs, rpn_scores, rois, roi_indices, anchor = rpn.forward(x, img_size,
                                                                  scale=1.0)
    jax.block_until_ready((rpn_locs, rpn_scores, rois, roi_indices))

    assert rpn_locs.shape == (N, H * W * rpn.n_anchor, 4)
    assert rpn_scores.shape == (N, H * W * rpn.n_anchor, 2)
    assert anchor.shape == (H * W * rpn.n_anchor, 4)

    # numeric check vs f32 XLA reference (loose tol: kernel uses bf16 MXU inputs)
    ref_locs, ref_scores = _reference_head(x, rpn._w_conv1, rpn._w_score, rpn._w_loc)
    np.testing.assert_allclose(np.asarray(rpn_locs), np.asarray(ref_locs),
                               rtol=0.2, atol=5e-3)
    np.testing.assert_allclose(np.asarray(rpn_scores), np.asarray(ref_scores),
                               rtol=0.2, atol=5e-3)
    _, _, fg_k = _rpn_head(x, rpn.w1, rpn.b1, rpn.whead, rpn.bhead,
                           n_anchor=rpn.n_anchor)
    ref_fg = jax.nn.softmax(ref_scores, axis=-1)[..., 1]
    np.testing.assert_allclose(np.asarray(fg_k), np.asarray(ref_fg),
                               rtol=0.0, atol=2e-2)
    print("KERNEL_OK")
</pallas_src>

<mosaic_0001>
module attributes {stable_mosaic.version = 11 : i64} {
  func.func @_rpn_head_kernel(%arg0: i32, %arg1: i32, %arg2: memref<1x64x1152xbf16, #tpu.memory_space<vmem>>, %arg3: memref<1152x128xbf16, #tpu.memory_space<vmem>>, %arg4: memref<1x128xf32, #tpu.memory_space<vmem>>, %arg5: memref<128x128xbf16, #tpu.memory_space<vmem>>, %arg6: memref<1x128xf32, #tpu.memory_space<vmem>>, %arg7: memref<1x64x128xf32, #tpu.memory_space<vmem>>) attributes {dimension_semantics = [#tpu.dimension_semantics<parallel>, #tpu.dimension_semantics<parallel>], iteration_bounds = array<i64: 2, 1>, scalar_prefetch = 0 : i64, scratch_operands = 0 : i64, tpu.core_type = #tpu.core_type<tc>, window_params = [{transform_indices = @transform_0, window_bounds = array<i64: 1, 64, 1152>}, {pipeline_mode = #tpu.pipeline_mode<synchronous>, transform_indices = @transform_1, window_bounds = array<i64: 1152, 128>}, {pipeline_mode = #tpu.pipeline_mode<synchronous>, transform_indices = @transform_2, window_bounds = array<i64: 1, 128>}, {pipeline_mode = #tpu.pipeline_mode<synchronous>, transform_indices = @transform_3, window_bounds = array<i64: 128, 128>}, {pipeline_mode = #tpu.pipeline_mode<synchronous>, transform_indices = @transform_4, window_bounds = array<i64: 1, 128>}, {transform_indices = @transform_5, window_bounds = array<i64: 1, 64, 128>}]} {
    %c0 = arith.constant 0 : index
    %c0_0 = arith.constant 0 : index
    %c0_1 = arith.constant 0 : index
    %0 = vector.load %arg2[%c0, %c0_0, %c0_1] : memref<1x64x1152xbf16, #tpu.memory_space<vmem>>, vector<1x64x1152xbf16>
    %1 = vector.shape_cast %0 : vector<1x64x1152xbf16> to vector<64x1152xbf16>
    %c0_2 = arith.constant 0 : index
    %c0_3 = arith.constant 0 : index
    %2 = vector.load %arg3[%c0_2, %c0_3] : memref<1152x128xbf16, #tpu.memory_space<vmem>>, vector<1152x128xbf16>
    %cst = arith.constant dense<0.000000e+00> : vector<64x128xf32>
    %3 = tpu.matmul %1, %2, %cst {dimension_numbers = #tpu.dot_dimension_numbers<[1], [0], [0], [1], [0, 0, 1, 1], [], []>} : vector<64x1152xbf16>, vector<1152x128xbf16>, vector<64x128xf32> -> vector<64x128xf32>
    %c0_4 = arith.constant 0 : index
    %c0_5 = arith.constant 0 : index
    %4 = vector.load %arg4[%c0_4, %c0_5] : memref<1x128xf32, #tpu.memory_space<vmem>>, vector<1x128xf32>
    %5 = vector.broadcast %4 : vector<1x128xf32> to vector<64x128xf32>
    %6 = arith.addf %3, %5 : vector<64x128xf32>
    %cst_6 = arith.constant 0.000000e+00 : f32
    %7 = vector.broadcast %cst_6 : f32 to vector<64x128xf32>
    %8 = arith.maximumf %6, %7 : vector<64x128xf32>
    %9 = arith.truncf %8 : vector<64x128xf32> to vector<64x128xbf16>
    %c0_7 = arith.constant 0 : index
    %c0_8 = arith.constant 0 : index
    %10 = vector.load %arg5[%c0_7, %c0_8] : memref<128x128xbf16, #tpu.memory_space<vmem>>, vector<128x128xbf16>
    %cst_9 = arith.constant dense<0.000000e+00> : vector<64x128xf32>
    %11 = tpu.matmul %9, %10, %cst_9 {dimension_numbers = #tpu.dot_dimension_numbers<[1], [0], [0], [1], [0, 0, 1, 1], [], []>} : vector<64x128xbf16>, vector<128x128xbf16>, vector<64x128xf32> -> vector<64x128xf32>
    %c0_10 = arith.constant 0 : index
    %c0_11 = arith.constant 0 : index
    %12 = vector.load %arg6[%c0_10, %c0_11] : memref<1x128xf32, #tpu.memory_space<vmem>>, vector<1x128xf32>
    %13 = vector.broadcast %12 : vector<1x128xf32> to vector<64x128xf32>
    %14 = arith.addf %11, %13 : vector<64x128xf32>
    %15 = vector.extract_strided_slice %14 {offsets = [0, 9], sizes = [64, 9], strides = [1, 1]} : vector<64x128xf32> to vector<64x9xf32>
    %16 = vector.extract_strided_slice %14 {offsets = [0, 0], sizes = [64, 9], strides = [1, 1]} : vector<64x128xf32> to vector<64x9xf32>
    %17 = arith.subf %15, %16 : vector<64x9xf32>
    %cst_12 = arith.constant 0.000000e+00 : f32
    %18 = vector.broadcast %cst_12 : f32 to vector<64x9xf32>
    %19 = arith.subf %18, %17 : vector<64x9xf32>
    %20 = math.exp %19 : vector<64x9xf32>
    %cst_13 = arith.constant 1.000000e+00 : f32
    %21 = vector.broadcast %cst_13 : f32 to vector<64x9xf32>
    %22 = arith.addf %21, %20 : vector<64x9xf32>
    %23 = tpu.reciprocal %22 {approx = true} : vector<64x9xf32> -> vector<64x9xf32>
    %c0_14 = arith.constant 0 : index
    %c0_15 = arith.constant 0 : index
    %c0_16 = arith.constant 0 : index
    %24 = vector.load %arg7[%c0_14, %c0_15, %c0_16] : memref<1x64x128xf32, #tpu.memory_space<vmem>>, vector<1x64x128xf32>
    %25 = vector.shape_cast %24 : vector<1x64x128xf32> to vector<64x128xf32>
    %26 = vector.shape_cast %14 : vector<64x128xf32> to vector<1x64x128xf32>
    tpu.vector_store %arg7[%c0_14, %c0_15, %c0_16], %26 {strides = array<i32>} : memref<1x64x128xf32, #tpu.memory_space<vmem>>, vector<1x64x128xf32>,
    %c0_17 = arith.constant 0 : index
    %c0_18 = arith.constant 0 : index
    %c54 = arith.constant 54 : index
    %27 = vector.load %arg7[%c0_17, %c0_18, %c54] : memref<1x64x128xf32, #tpu.memory_space<vmem>>, vector<1x64x9xf32>
    %28 = vector.shape_cast %27 : vector<1x64x9xf32> to vector<64x9xf32>
    %29 = vector.shape_cast %23 : vector<64x9xf32> to vector<1x64x9xf32>
    tpu.vector_store %arg7[%c0_17, %c0_18, %c54], %29 {strides = array<i32>} : memref<1x64x128xf32, #tpu.memory_space<vmem>>, vector<1x64x9xf32>,
    return
  }
  func.func @transform_0(%arg0: i32, %arg1: i32) -> (i32, i32, i32) {
    %c0_i32 = arith.constant 0 : i32
    %c0_i32_0 = arith.constant 0 : i32
    return %arg0, %arg1, %c0_i32 : i32, i32, i32
  }
  func.func @transform_1(%arg0: i32, %arg1: i32) -> (i32, i32) {
    %c0_i32 = arith.constant 0 : i32
    %c0_i32_0 = arith.constant 0 : i32
    %c0_i32_1 = arith.constant 0 : i32
    return %c0_i32, %c0_i32_0 : i32, i32
  }
  func.func @transform_2(%arg0: i32, %arg1: i32) -> (i32, i32) {
    %c0_i32 = arith.constant 0 : i32
    %c0_i32_0 = arith.constant 0 : i32
    %c0_i32_1 = arith.constant 0 : i32
    return %c0_i32, %c0_i32_0 : i32, i32
  }
  func.func @transform_3(%arg0: i32, %arg1: i32) -> (i32, i32) {
    %c0_i32 = arith.constant 0 : i32
    %c0_i32_0 = arith.constant 0 : i32
    %c0_i32_1 = arith.constant 0 : i32
    return %c0_i32, %c0_i32_0 : i32, i32
  }
  func.func @transform_4(%arg0: i32, %arg1: i32) -> (i32, i32) {
    %c0_i32 = arith.constant 0 : i32
    %c0_i32_0 = arith.constant 0 : i32
    %c0_i32_1 = arith.constant 0 : i32
    return %c0_i32, %c0_i32_0 : i32, i32
  }
  func.func @transform_5(%arg0: i32, %arg1: i32) -> (i32, i32, i32) {
    %c0_i32 = arith.constant 0 : i32
    %c0_i32_0 = arith.constant 0 : i32
    return %arg0, %arg1, %c0_i32 : i32, i32, i32
  }
}

</mosaic_0001>

<bundles_post_ra>
// kernel: _rpn_head.1
= control target key start
LH: loop header
LB: loop body
LE: loop exit
PB: predicated region body
PF: predicated region fallthrough
CT: control target
= control target key end

     0   :  { %s2375_s18 = smov 0   ;;  %s2377_s19 = smov 0   ;;  %s2774_s0 = inlined_call_operand.vmem [shape: bf16[2,64,1152], index: 0, kind: input, shape index: {}]   ;;  %s2775_s1 = inlined_call_operand.vmem [shape: bf16[1152,128], index: 1, kind: input, shape index: {}]   ;;  %s2776_s2 = inlined_call_operand.vmem [shape: f32[1,128], index: 2, kind: input, shape index: {}]   ;;  %s2777_s3 = inlined_call_operand.vmem [shape: bf16[128,128], index: 3, kind: input, shape index: {}]   ;;  %s2778_s4 = inlined_call_operand.vmem [shape: f32[1,128], index: 4, kind: input, shape index: {}]   ;;  %s2779_s5 = inlined_call_operand.vmem [shape: f32[2,64,128], index: 5, kind: output, shape index: {}]  }
   0x1   :  { %s2379_s20 = smov 0  }
   0x2 LB: > { %s27_s21 = sadd.s32 1, %s2337_s19  ;;  %p1771_p0 = scmp.ge.s32.totalorder %s2341_s20, 1  ;;  %s2341_s20 = sphi %s2379_s20, %s15_s20   ;;  %s2337_s19 = sphi %s2377_s19, %s2797_s19   ;;  %s2333_s18 = sphi %s2375_s18, %s2796_s18  }
   0x3   : > { %p29_p1 = scmp.ge.s32.totalorder %s27_s21, 2  ;;  %p209_p2 = scmp.lt.s32.totalorder %s2341_s20, 3 }
   0x5   : > { %s2799_s21 = smov (%p29_p1, %s27_s21), 0  ;;  %p210_p3 = pnand %p1771_p0, %p209_p2 }
   0x7   : > { %213 = sbr.rel (%p210_p3) target bundleno = 796 (0x31c), region = 40 }
   0xc   : > { %v2155_v0 = vld [vmem:[%s2775_s1 + $0x78] sm:$0xff]   ;;  %v2159_v4 = vld [vmem:[%s2775_s1 + $0x70] sm:$0xff]   ;;  %v2163_v8 = vld [vmem:[%s2775_s1 + $0x68] sm:$0xff]   ;;  %p247_p4 = scmp.lt.s32.totalorder %s2333_s18, 1  ;;  %vm1668_vm0 = vcmask 515504  }
   0xd   : > { %v2156_v1 = vld [vmem:[%s2775_s1 + $0x38] sm:$0xff]   ;;  %1896 = vmatprep.subr.bf16.mxu0 %v2155_v0  ;;  %v2160_v5 = vld [vmem:[%s2775_s1 + $0x30] sm:$0xff]   ;;  %v2164_v9 = vld [vmem:[%s2775_s1 + $0x28] sm:$0xff]  }
   0xe   : > { %v2157_v2 = vld [vmem:[%s2775_s1 + $0xf8] sm:$0xff]   ;;  %1897 = vmatpush3.bf16.msra.mxu0 %v2156_v1  ;;  %v2161_v6 = vld [vmem:[%s2775_s1 + $0xf0] sm:$0xff]   ;;  %v2165_v10 = vld [vmem:[%s2775_s1 + $0xe8] sm:$0xff]   ;;  %s2801_s18 = smov (!%p247_p4, %s2333_s18), 1 }
   0xf   : > { %v2158_v3 = vld [vmem:[%s2775_s1 + $0xb8] sm:$0xff]   ;;  %1936 = vmatprep.subr.bf16.mxu1 %v2157_v2  ;;  %1898 = vmatprep.subr.bf16.mxu0 %v2159_v4  ;;  %v2162_v7 = vld [vmem:[%s2775_s1 + $0xb0] sm:$0xff]   ;;  %v2166_v11 = vld [vmem:[%s2775_s1 + $0xa8] sm:$0xff]   ;;  %s2128_s30 = smul.u32 288, %s2801_s18  ;;  %s1895_s24 = sshll.u32 %s2801_s18, 6 }
  0x10   : > { %1937 = vmatpush3.bf16.msra.mxu1 %v2158_v3  ;;  %v2167_v12 = vld [vmem:[%s2775_s1 + $0x60] sm:$0xff]   ;;  %v2171_v16 = vld [vmem:[%s2775_s1 + $0x58] sm:$0xff]   ;;  %v2175_v20 = vld [vmem:[%s2775_s1 + $0x50] sm:$0xff]   ;;  %s2739_s29 = scalar_lea.vmem %s2779_s5, %s1895_s24  ;;  %s2343_s18 = smov 9  }
  0x11   : > { %1938 = vmatprep.subr.bf16.mxu1 %v2161_v6  ;;  %v2168_v13 = vld [vmem:[%s2775_s1 + $0x20] sm:$0xff]   ;;  %v2172_v17 = vld [vmem:[%s2775_s1 + $0x18] sm:$0xff]   ;;  %v2176_v21 = vld [vmem:[%s2775_s1 + $0x10] sm:$0xff]   ;;  %s2490_s16 = scalar_lea.vmem %s2774_s0, %s2128_s30  ;;  %s2344_s30 = smov 45  }
  0x12   : > { %1899 = vmatpush3.bf16.msra.mxu0 %v2160_v5  ;;  %v2169_v14 = vld [vmem:[%s2775_s1 + $0xe0] sm:$0xff]   ;;  %v2173_v18 = vld [vmem:[%s2775_s1 + $0xd8] sm:$0xff]   ;;  %v2177_v22 = vld [vmem:[%s2775_s1 + $0xd0] sm:$0xff]  }
  0x13   : > { %1900 = vmatprep.subr.bf16.mxu0 %v2163_v8  ;;  %v2170_v15 = vld [vmem:[%s2775_s1 + $0xa0] sm:$0xff]   ;;  %v2174_v19 = vld [vmem:[%s2775_s1 + $0x98] sm:$0xff]   ;;  %v2178_v23 = vld [vmem:[%s2775_s1 + $0x90] sm:$0xff]  }
  0x14   : > { %1939 = vmatpush3.bf16.msra.mxu1 %v2162_v7  ;;  %v2179_v24 = vld [vmem:[%s2775_s1 + $0x48] sm:$0xff]   ;;  %v2183_v28 = vld [vmem:[%s2775_s1 + $0x40] sm:$0xff]   ;;  %v2190_v34 = vld [vmem:[%s2775_s1 + $0x178] sm:$0xff]  }
  0x15   : > { %1940 = vmatprep.subr.bf16.mxu1 %v2165_v10  ;;  %v2180_v25 = vld [vmem:[%s2775_s1 + $0x8] sm:$0xff]   ;;  %v2184_v29 = vld [vmem:[%s2775_s1] sm:$0xff]   ;;  %v2194_v37 = vld [vmem:[%s2775_s1 + $0x138] sm:$0xff]  }
  0x16   : > { %1901 = vmatpush3.bf16.msra.mxu0 %v2164_v9  ;;  %v2181_v26 = vld [vmem:[%s2775_s1 + $0xc8] sm:$0xff]   ;;  %v2185_v30 = vld [vmem:[%s2775_s1 + $0xc0] sm:$0xff]   ;;  %v2195_v38 = vld [vmem:[%s2775_s1 + $0x1f8] sm:$0xff]  }
  0x17   : > { %1902 = vmatprep.subr.bf16.mxu0 %v2167_v12  ;;  %v2182_v27 = vld [vmem:[%s2775_s1 + $0x88] sm:$0xff]   ;;  %v2186_v31 = vld [vmem:[%s2490_s16] ss:$36 sps:$4 sm:$0xff]   ;;  %v2196_v39 = vld [vmem:[%s2775_s1 + $0x1b8] sm:$0xff]  }
  0x18   : > { %1941 = vmatpush3.bf16.msra.mxu1 %v2166_v11  ;;  %v2188_v32 = vld [vmem:[%s2490_s16 + $0x4] ss:$36 sps:$4 sm:$0xff]   ;;  %v2193_v36 = vld [vmem:[%s2490_s16 + $0xc] ss:$36 sps:$4 sm:$0xff]   ;;  %v2205_v47 = vld [vmem:[%s2490_s16 + $0x54] ss:$36 sps:$4 sm:$0xff]  }
  0x19   : > { %1942 = vmatprep.subr.bf16.mxu1 %v2169_v14  ;;  %v2189_v33 = vld [vmem:[%s2775_s1 + $0x80] sm:$0xff]   ;;  %1107 = vmatprep.mubr.bf16.mxu0 %v2188_v32  ;;  %v2191_v35 = vld [vmem:[%s2490_s16 + $0x8] ss:$36 sps:$4 sm:$0xff]   ;;  %v2197_v40 = vld [vmem:[%s2775_s1 + $0x170] sm:$0xff]  }
  0x1a   : > { %1903 = vmatpush3.bf16.msra.mxu0 %v2168_v13  ;;  %1172 = vmatprep.mubr.bf16.mxu1 %v2193_v36  ;;  %v2198_v41 = vld [vmem:[%s2775_s1 + $0x130] sm:$0xff]   ;;  %v2203_v45 = vld [vmem:[%s2490_s16 + $0x48] ss:$36 sps:$4 sm:$0xff]   ;;  %v2211_v52 = vld [vmem:[%s2775_s1 + $0x160] sm:$0xff]  }
  0x1b   : > { %1904 = vmatprep.subr.bf16.mxu0 %v2171_v16  ;;  %v2199_v42 = vld [vmem:[%s2775_s1 + $0x1f0] sm:$0xff]   ;;  %v2204_v46 = vld [vmem:[%s2775_s1 + $0x168] sm:$0xff]   ;;  %v2212_v53 = vld [vmem:[%s2775_s1 + $0x120] sm:$0xff]  }
  0x1c   : > { %1943 = vmatpush3.bf16.msra.mxu1 %v2170_v15  ;;  %v2200_v43 = vld [vmem:[%s2490_s16 + $0x4c] ss:$36 sps:$4 sm:$0xff]   ;;  %v2213_v54 = vld [vmem:[%s2775_s1 + $0x1e0] sm:$0xff]   ;;  %v2214_v55 = vld [vmem:[%s2490_s16 + $0x94] ss:$36 sps:$4 sm:$0xff]  }
  0x1d   : > { %1944 = vmatprep.subr.bf16.mxu1 %v2173_v18  ;;  %v2202_v44 = vld [vmem:[%s2775_s1 + $0x1b0] sm:$0xff]   ;;  %v2207_v48 = vld [vmem:[%s2775_s1 + $0x128] sm:$0xff]   ;;  %v2216_v56 = vld [vmem:[%s2775_s1 + $0x1a0] sm:$0xff]  }
  0x1e   : > { %1905 = vmatpush3.bf16.msra.mxu0 %v2172_v17  ;;  %v2208_v49 = vld [vmem:[%s2490_s16 + $0x50] ss:$36 sps:$4 sm:$0xff]   ;;  %v2209_v50 = vld [vmem:[%s2775_s1 + $0x1e8] sm:$0xff]   ;;  %v2218_v58 = vld [vmem:[%s2775_s1 + $0x158] sm:$0xff]  }
  0x1f   : > { %1906 = vmatprep.subr.bf16.mxu0 %v2175_v20  ;;  %v2210_v51 = vld [vmem:[%s2775_s1 + $0x1a8] sm:$0xff]   ;;  %v2217_v57 = vld [vmem:[%s2490_s16 + $0x90] ss:$36 sps:$4 sm:$0xff]   ;;  %v2219_v59 = vld [vmem:[%s2490_s16 + $0x9c] ss:$36 sps:$4 sm:$0xff]  }
  0x20   : > { %1945 = vmatpush3.bf16.msra.mxu1 %v2174_v19  ;;  %v2221_v60 = vld [vmem:[%s2775_s1 + $0x118] sm:$0xff]   ;;  %v2225_v0 = vld [vmem:[%s2775_s1 + $0x150] sm:$0xff]   ;;  %v2232_v6 = vld [vmem:[%s2775_s1 + $0x148] sm:$0xff]  }
  0x21   : > { %1946 = vmatprep.subr.bf16.mxu1 %v2177_v22  ;;  %v2222_v61 = vld [vmem:[%s2490_s16 + $0x98] ss:$36 sps:$4 sm:$0xff]   ;;  %v2226_v1 = vld [vmem:[%s2775_s1 + $0x110] sm:$0xff]   ;;  %v2233_v7 = vld [vmem:[%s2490_s16 + $0xe4] ss:$36 sps:$4 sm:$0xff]  }
  0x22   : > { %1907 = vmatpush3.bf16.msra.mxu0 %v2176_v21  ;;  %v2223_v62 = vld [vmem:[%s2775_s1 + $0x1d8] sm:$0xff]   ;;  %v2227_v2 = vld [vmem:[%s2775_s1 + $0x1d0] sm:$0xff]   ;;  %v2235_v8 = vld [vmem:[%s2775_s1 + $0x108] sm:$0xff]  }
  0x23   : > { %1908 = vmatprep.subr.bf16.mxu0 %v2179_v24  ;;  %v2224_v63 = vld [vmem:[%s2775_s1 + $0x198] sm:$0xff]   ;;  %v2230_v4 = vld [vmem:[%s2775_s1 + $0x190] sm:$0xff]   ;;  %v2236_v9 = vld [vmem:[%s2490_s16 + $0xe0] ss:$36 sps:$4 sm:$0xff]  }
  0x24   : > { %1947 = vmatpush3.bf16.msra.mxu1 %v2178_v23  ;;  %v2228_v3 = vld [vmem:[%s2490_s16 + $0xdc] ss:$36 sps:$4 sm:$0xff]   ;;  %v2237_v10 = vld [vmem:[%s2775_s1 + $0x1c8] sm:$0xff]   ;;  %v2242_v15 = vld [vmem:[%s2490_s16 + $0x10] ss:$36 sps:$4 sm:$0xff]  }
  0x25   : > { %1948 = vmatprep.subr.bf16.mxu1 %v2181_v26  ;;  %v2231_v5 = vld [vmem:[%s2490_s16 + $0xd8] ss:$36 sps:$4 sm:$0xff]   ;;  %v2238_v11 = vld [vmem:[%s2775_s1 + $0x188] sm:$0xff]   ;;  %v2239_v12 = vld [vmem:[%s2775_s1 + $0x140] sm:$0xff]  }
  0x26   : > { %1909 = vmatpush3.bf16.msra.mxu0 %v2180_v25  ;;  %v2240_v13 = vld [vmem:[%s2775_s1 + $0x100] sm:$0xff]   ;;  %v2244_v16 = vld [vmem:[%s2490_s16 + $0x14] ss:$36 sps:$4 sm:$0xff]   ;;  %v2254_v24 = vld [vmem:[%s2775_s1 + $0x228] sm:$0xff]  }
  0x27   : > { %1910 = vmatprep.subr.bf16.mxu0 %v2183_v28  ;;  %v2241_v14 = vld [vmem:[%s2775_s1 + $0x1c0] sm:$0xff]   ;;  %v2246_v18 = vld [vmem:[%s2775_s1 + $0x238] sm:$0xff]   ;;  %v2250_v21 = vld [vmem:[%s2775_s1 + $0x230] sm:$0xff]  }
  0x28   : > { %1949 = vmatpush3.bf16.msra.mxu1 %v2182_v27  ;;  %v2245_v17 = vld [vmem:[%s2775_s1 + $0x180] sm:$0xff]   ;;  %v2247_v19 = vld [vmem:[%s2490_s16 + $0x18] ss:$36 sps:$4 sm:$0xff]   ;;  %v2267_v32 = vld [vmem:[%s2490_s16 + $0xec] ss:$36 sps:$4 sm:$0xff]  }
  0x29   : > { %1950 = vmatprep.subr.bf16.mxu1 %v2185_v30  ;;  %v2249_v20 = vld [vmem:[%s2490_s16 + $0x1c] ss:$36 sps:$4 sm:$0xff]   ;;  %v2255_v25 = vld [vmem:[%s2490_s16 + $0x64] ss:$36 sps:$4 sm:$0xff]  }
  0x2a   : > { %1911 = vmatpush3.bf16.msra.mxu0 %v2184_v29  ;;  %v2251_v22 = vld [vmem:[%s2490_s16 + $0x5c] ss:$36 sps:$4 sm:$0xff]   ;;  %v2259_v27 = vld [vmem:[%s2490_s16 + $0xa4] ss:$36 sps:$4 sm:$0xff]   ;;  %v2263_v29 = vld [vmem:[%s2490_s16 + $0xac] ss:$36 sps:$4 sm:$0xff]  }
  0x2b   : > { %1976 = vmatprep.subr.bf16.mxu0 %v2190_v34  ;;  %v2253_v23 = vld [vmem:[%s2490_s16 + $0x58] ss:$36 sps:$4 sm:$0xff]   ;;  %v2258_v26 = vld [vmem:[%s2775_s1 + $0x220] sm:$0xff]   ;;  %v2265_v34 = vld [vmem:[%s2490_s16 + $0xa8] ss:$36 sps:$4 sm:$0xff]  }
  0x2c   : > { %1951 = vmatpush3.bf16.msra.mxu1 %v2189_v33  ;;  %v2257_v28 = vld [vmem:[%s2490_s16 + $0x60] ss:$36 sps:$4 sm:$0xff]   ;;  %v2262_v30 = vld [vmem:[%s2775_s1 + $0x218] sm:$0xff]   ;;  %v2266_v33 = vld [vmem:[%s2775_s1 + $0x210] sm:$0xff]  }
  0x2d   : > { %1108 = vmatmul.mubr.bf16.vlgmr.msra.gmra.mxu0 %v2186_v31  ;;  %2016 = vmatprep.subr.bf16.mxu1 %v2195_v38  ;;  %v2261_v31 = vld [vmem:[%s2490_s16 + $0xa0] ss:$36 sps:$4 sm:$0xff]   ;;  %v2269_v36 = vld [vmem:[%s2490_s16 + $0xe8] ss:$36 sps:$4 sm:$0xff]  }
  0x2e   : > { %1977 = vmatpush3.bf16.msra.mxu0 %v2194_v37  ;;  %1115 = vmatprep.mubr.bf16.mxu0 %v2200_v43  ;;  %v2270_v37 = vld [vmem:[%s2775_s1 + $0x208] sm:$0xff]   ;;  %v2275_v38 = vld [vmem:[%s2490_s16 + $0x20] ss:$36 sps:$4 sm:$0xff]   ;;  %v2278_v43 = vld [vmem:[%s2490_s16 + $0xf8] ss:$36 sps:$4 sm:$0xff]  }
  0x2f   : > { %1173 = vmatmul.mubr.bf16.vlgmr.msra.gmra.mxu1 %v2191_v35  ;;  %1978 = vmatprep.subr.bf16.mxu0 %v2197_v40  ;;  %v2271_v35 = vld [vmem:[%s2490_s16 + $0xf4] ss:$36 sps:$4 sm:$0xff]   ;;  %v2274_v40 = vld [vmem:[%s2775_s1 + $0x200] sm:$0xff]  }
  0x30   : > { %2017 = vmatpush3.bf16.msra.mxu1 %v2196_v39  ;;  %1180 = vmatprep.mubr.bf16.mxu1 %v2205_v47  ;;  %v2273_v39 = vld [vmem:[%s2490_s16 + $0xf0] ss:$36 sps:$4 sm:$0xff]   ;;  %v2282_v47 = vld [vmem:[%s2777_s3 + $0x20] sm:$0xff]  }
  0x31   : > { %2018 = vmatprep.subr.bf16.mxu1 %v2199_v42  ;;  %v2277_v42 = vld [vmem:[%s2490_s16 + $0xb0] ss:$36 sps:$4 sm:$0xff]  }
  0x32   : > { %1979 = vmatpush3.bf16.msra.mxu0 %v2198_v41  ;;  %v2276_v41 = vld [vmem:[%s2490_s16 + $0x68] ss:$36 sps:$4 sm:$0xff]  }
  0x33   : > { %1980 = vmatprep.subr.bf16.mxu0 %v2204_v46  ;;  %v2281_v46 = vld [vmem:[%s2777_s3 + $0x28] sm:$0xff]  }
  0x34   : > { %2019 = vmatpush3.bf16.msra.mxu1 %v2202_v44  ;;  %v2279_v44 = vld [vmem:[%s2777_s3 + $0x38] sm:$0xff]  }
  0x35   : > { %1116 = vmatmul.mubr.bf16.gmra.mxu0 %v2203_v45  ;;  %2020 = vmatprep.subr.bf16.mxu1 %v2209_v50  ;;  %v2280_v45 = vld [vmem:[%s2777_s3 + $0x30] sm:$0xff]   ;;  %v2285_v50 = vld [vmem:[%s2777_s3 + $0x8] sm:$0xff]  }
  0x36   : > { %1981 = vmatpush3.bf16.msra.mxu0 %v2207_v48  ;;  %1123 = vmatprep.mubr.bf16.mxu0 %v2214_v55  ;;  %v2283_v48 = vld [vmem:[%s2777_s3 + $0x18] sm:$0xff]  }
  0x37   : > { %1181 = vmatmul.mubr.bf16.gmra.mxu1 %v2208_v49  ;;  %1982 = vmatprep.subr.bf16.mxu0 %v2211_v52  ;;  %v2284_v49 = vld [vmem:[%s2777_s3 + $0x10] sm:$0xff]  }
  0x38   : > { %2021 = vmatpush3.bf16.msra.mxu1 %v2210_v51  ;;  %1188 = vmatprep.mubr.bf16.mxu1 %v2219_v59  ;;  %v2286_v51 = vld [vmem:[%s2777_s3] sm:$0xff]  }
  0x39   : > { %2022 = vmatprep.subr.bf16.mxu1 %v2213_v54 }
  0x3a   : > { %1983 = vmatpush3.bf16.msra.mxu0 %v2212_v53 }
  0x3b   : > { %1984 = vmatprep.subr.bf16.mxu0 %v2218_v58 }
  0x3c   : > { %2023 = vmatpush3.bf16.msra.mxu1 %v2216_v56 }
  0x3d   : > { %1124 = vmatmul.mubr.bf16.gmra.mxu0 %v2217_v57  ;;  %2024 = vmatprep.subr.bf16.mxu1 %v2223_v62 }
  0x3e   : > { %1985 = vmatpush3.bf16.msra.mxu0 %v2221_v60  ;;  %1131 = vmatprep.mubr.bf16.mxu0 %v2228_v3 }
  0x3f   : > { %1189 = vmatmul.mubr.bf16.gmra.mxu1 %v2222_v61  ;;  %1986 = vmatprep.subr.bf16.mxu0 %v2225_v0 }
  0x40   : > { %2025 = vmatpush3.bf16.msra.mxu1 %v2224_v63  ;;  %1196 = vmatprep.mubr.bf16.mxu1 %v2233_v7 }
  0x41   : > { %2026 = vmatprep.subr.bf16.mxu1 %v2227_v2 }
  0x42   : > { %1987 = vmatpush3.bf16.msra.mxu0 %v2226_v1 }
  0x43   : > { %1988 = vmatprep.subr.bf16.mxu0 %v2232_v6 }
  0x44   : > { %2027 = vmatpush3.bf16.msra.mxu1 %v2230_v4 }
  0x45   : > { %1132 = vmatmul.mubr.bf16.gmra.mxu0 %v2231_v5  ;;  %2028 = vmatprep.subr.bf16.mxu1 %v2237_v10 }
  0x46   : > { %1989 = vmatpush3.bf16.msra.mxu0 %v2235_v8  ;;  %1237 = vmatprep.mubr.bf16.mxu0 %v2244_v16 }
  0x47   : > { %1197 = vmatmul.mubr.bf16.gmra.mxu1 %v2236_v9  ;;  %1990 = vmatprep.subr.bf16.mxu0 %v2239_v12 }
  0x48   : > { %2029 = vmatpush3.bf16.msra.mxu1 %v2238_v11  ;;  %1302 = vmatprep.mubr.bf16.mxu1 %v2249_v20 }
  0x49   : > { %2030 = vmatprep.subr.bf16.mxu1 %v2241_v14 }
  0x4a   : > { %1991 = vmatpush3.bf16.msra.mxu0 %v2240_v13 }
  0x4b   : > { %2080 = vmatprep.subr.bf16.mxu0 %v2246_v18 }
  0x4c   : > { %2031 = vmatpush3.bf16.msra.mxu1 %v2245_v17 }
  0x4d   : > { %1238 = vmatmul.mubr.bf16.vlgmr.msra.gmra.mxu0 %v2242_v15  ;;  %2104 = vmatprep.subr.bf16.mxu1 %v2279_v44 }
  0x4e   : > { %2081 = vmatpush3.bf16.msra.mxu0 %v2246_v18  ;;  %1245 = vmatprep.mubr.bf16.mxu0 %v2251_v22 }
  0x4f   : > { %1303 = vmatmul.mubr.bf16.vlgmr.msra.gmra.mxu1 %v2247_v19  ;;  %2082 = vmatprep.subr.bf16.mxu0 %v2250_v21 }
  0x50   : > { %1310 = vmatprep.mubr.bf16.mxu1 %v2255_v25  ;;  %2105 = vmatpush3.bf16.msra.mxu1 %v2279_v44 }
  0x51   : > { %2106 = vmatprep.subr.bf16.mxu1 %v2280_v45 }
  0x52   : > { %2083 = vmatpush3.bf16.msra.mxu0 %v2250_v21 }
  0x53   : > { %2084 = vmatprep.subr.bf16.mxu0 %v2254_v24 }
  0x54   : > { %2107 = vmatpush3.bf16.msra.mxu1 %v2280_v45 }
  0x55   : > { %1246 = vmatmul.mubr.bf16.gmra.mxu0 %v2253_v23  ;;  %2108 = vmatprep.subr.bf16.mxu1 %v2281_v46 }
  0x56   : > { %1253 = vmatprep.mubr.bf16.mxu0 %v2259_v27  ;;  %2085 = vmatpush3.bf16.msra.mxu0 %v2254_v24 }
  0x57   : > { %2086 = vmatprep.subr.bf16.mxu0 %v2258_v26  ;;  %1311 = vmatmul.mubr.bf16.gmra.mxu1 %v2257_v28 }
  0x58   : > { %1318 = vmatprep.mubr.bf16.mxu1 %v2263_v29  ;;  %2109 = vmatpush3.bf16.msra.mxu1 %v2281_v46 }
  0x59   : > { %2110 = vmatprep.subr.bf16.mxu1 %v2282_v47 }
  0x5a   : > { %2087 = vmatpush3.bf16.msra.mxu0 %v2258_v26 }
  0x5b   : > { %2088 = vmatprep.subr.bf16.mxu0 %v2262_v30 }
  0x5c   : > { %2111 = vmatpush3.bf16.msra.mxu1 %v2282_v47 }
  0x5d   : > { %1254 = vmatmul.mubr.bf16.gmra.mxu0 %v2261_v31  ;;  %2112 = vmatprep.subr.bf16.mxu1 %v2283_v48 }
  0x5e   : > { %1261 = vmatprep.mubr.bf16.mxu0 %v2267_v32  ;;  %2089 = vmatpush3.bf16.msra.mxu0 %v2262_v30 }
  0x5f   : > { %2090 = vmatprep.subr.bf16.mxu0 %v2266_v33  ;;  %1319 = vmatmul.mubr.bf16.gmra.mxu1 %v2265_v34 }
  0x60   : > { %1326 = vmatprep.mubr.bf16.mxu1 %v2271_v35  ;;  %2113 = vmatpush3.bf16.msra.mxu1 %v2283_v48 }
  0x61   : > { %2114 = vmatprep.subr.bf16.mxu1 %v2284_v49 }
  0x62   : > { %2091 = vmatpush3.bf16.msra.mxu0 %v2266_v33 }
  0x63   : > { %2092 = vmatprep.subr.bf16.mxu0 %v2270_v37 }
  0x64   : > { %2115 = vmatpush3.bf16.msra.mxu1 %v2284_v49 }
  0x65   : > { %1262 = vmatmul.mubr.bf16.gmra.mxu0 %v2269_v36  ;;  %2116 = vmatprep.subr.bf16.mxu1 %v2285_v50 }
  0x66   : > { %2096 = vmatprep.mubr.bf16.mxu0 %v2275_v38  ;;  %2093 = vmatpush3.bf16.msra.mxu0 %v2270_v37 }
  0x67   : > { %2094 = vmatprep.subr.bf16.mxu0 %v2274_v40  ;;  %1327 = vmatmul.mubr.bf16.gmra.mxu1 %v2273_v39 }
  0x68   : > { %2117 = vmatpush3.bf16.msra.mxu1 %v2285_v50 }
  0x69   : > { %2118 = vmatprep.subr.bf16.mxu1 %v2286_v51 }
  0x6a   : > { %2095 = vmatpush3.bf16.msra.mxu0 %v2274_v40 }
  0x6c   : > { %2119 = vmatpush3.bf16.msra.mxu1 %v2286_v51 }
  0x6d   : > { %2097 = vmatmul.mubr.bf16.vlgmr.msra.gmra.mxu0 %v2276_v41  ;;  %v1775_v41 = vld [vmem:[%s2776_s2] ss:$0 sm:$0xff] }
  0x6e   : > { %2100 = vmatprep.mubr.bf16.mxu0 %v2277_v42 }
  0x75   : > { %2101 = vmatmul.mubr.bf16.gmra.mxu0 %v2278_v43 }
  0xed   : > { %v1912_v52 = vpop.f32.mrf.mxu0 }
  0xef   : > { %v1913_v53 = vpop.f32.mrf.mxu0  ;;  %v1952_v54 = vpop.f32.mrf.mxu1 }
  0xf0   : > { %v1914_v40 = vadd.f32 %v1913_v53, %v1912_v52 }
  0xf1   : > { %v1915_v55 = vpop.f32.mrf.mxu0  ;;  %v1953_v56 = vpop.f32.mrf.mxu1 }
  0xf2   : > { %v1110_v49 = vadd.f32 %v1914_v40, %v1775_v41  ;;  %v1954_v50 = vadd.f32 %v1953_v56, %v1952_v54 }
  0xf3   : > { %v1916_v57 = vpop.f32.mrf.mxu0  ;;  %v1955_v58 = vpop.f32.mrf.mxu1 }
  0xf4   : > { %v1917_v42 = vadd.f32 %v1916_v57, %v1915_v55 }
  0xf5   : > { %v1918_v59 = vpop.f32.mrf.mxu0  ;;  %v1956_v60 = vpop.f32.mrf.mxu1 }
  0xf6   : > { %v1113_v51 = vadd.f32 %v1917_v42, %v1775_v41 }
  0xf7   : > { %v1919_v61 = vpop.f32.mrf.mxu0  ;;  %v1958_v62 = vpop.f32.mrf.mxu1 }
  0xf8   : > { %v1920_v46 = vadd.f32 %v1919_v61, %v1918_v59  ;;  %v1175_v59 = vadd.f32 %v1954_v50, %v1110_v49 }
  0xf9   : > { %v1921_v63 = vpop.f32.mrf.mxu0  ;;  %v1959_v0 = vpop.f32.mrf.mxu1 }
  0xfb   : > { %v1922_v1 = vpop.f32.mrf.mxu0  ;;  %v1961_v2 = vpop.f32.mrf.mxu1 }
  0xfc   : > { %v1923_v43 = vadd.f32 %v1922_v1, %v1921_v63 }
  0xfd   : > { %v1962_v3 = vpop.f32.mrf.mxu1  ;;  %v1924_v4 = vpop.f32.mrf.mxu0 }
  0xff   : > { %v1925_v5 = vpop.f32.mrf.mxu0  ;;  %v2681_v6 = vpop.f32.mrf.mxu1 }
 0x100   : > { %v1926_v55 = vadd.f32 %v1925_v5, %v1924_v4 }
 0x101   : > { %v1927_v7 = vpop.f32.mrf.mxu0  ;;  %v2683_v8 = vpop.f32.mrf.mxu1 }
 0x102   : > { %v1966_v42 = vadd.f32 %v2683_v8, %v2681_v6 }
 0x103   : > { %v1928_v9 = vpop.f32.mrf.mxu0  ;;  %v2685_v10 = vpop.f32.mrf.mxu1 }
 0x104   : > { %2780 = vst [vmem:[#allocation2_spill] sm:$0xff] %v2685_v10  ;;  %v1929_v54 = vadd.f32 %v1928_v9, %v1927_v7 }
 0x105   : > { %v2687_v11 = vpop.f32.mrf.mxu1  ;;  %v2689_v12 = vpop.f32.mrf.mxu0 }
 0x106   : > { %2781 = vst [vmem:[#allocation3_spill] sm:$0xff] %v2687_v11  ;;  %v1960_v11 = vadd.f32 %v1959_v0, %v1958_v62 }
 0x107   : > { %v2691_v13 = vpop.f32.mrf.mxu0  ;;  %v2693_v14 = vpop.f32.mrf.mxu1 }
 0x108   : > { %2782 = vst [vmem:[#allocation4_spill] sm:$0xff] %v2693_v14  ;;  %v1118_v14 = vadd.f32 %v1920_v46, %v1775_v41  ;;  %v1932_v62 = vadd.f32 %v2691_v13, %v2689_v12 }
 0x109   : > { %v1933_v15 = vpop.f32.mrf.mxu0  ;;  %v2695_v16 = vpop.f32.mrf.mxu1 }
 0x10a   : > { %2783 = vst [vmem:[#allocation5_spill] sm:$0xff] %v2695_v16  ;;  %v1121_v16 = vadd.f32 %v1923_v43, %v1775_v41  ;;  %v1134_v12 = vadd.f32 %v1932_v62, %v1775_v41 }
 0x10b   : > { %v1934_v17 = vpop.f32.mrf.mxu0  ;;  %v2697_v18 = vpop.f32.mrf.mxu1  ;;  %v2788_v6 = vld [vmem:[#allocation2_spill] sm:$0xff] }
 0x10c   : > { %v1935_v61 = vadd.f32 %v1934_v17, %v1933_v15 }
 0x10d   : > { %v2699_v19 = vpop.f32.mrf.mxu1  ;;  %v1992_v20 = vpop.f32.mrf.mxu0  ;;  %v2789_v8 = vld [vmem:[#allocation3_spill] sm:$0xff] }
 0x10e   : > { %v1137_v15 = vadd.f32 %v1935_v61, %v1775_v41 }
 0x10f   : > { %v1993_v21 = vpop.f32.mrf.mxu0  ;;  %v2032_v22 = vpop.f32.mrf.mxu1  ;;  %v2790_v13 = vld [vmem:[#allocation4_spill] sm:$0xff] }
 0x110   : > { %v1994_v57 = vadd.f32 %v1993_v21, %v1992_v20 }
 0x111   : > { %v1995_v23 = vpop.f32.mrf.mxu0  ;;  %v2033_v24 = vpop.f32.mrf.mxu1 }
 0x112   : > { %v1240_v0 = vadd.f32 %v1994_v57, %v1175_v59  ;;  %v2034_v4 = vadd.f32 %v2033_v24, %v2032_v22  ;;  %v2791_v22 = vld [vmem:[#allocation5_spill] sm:$0xff] }
 0x113   : > { %v1996_v25 = vpop.f32.mrf.mxu0  ;;  %v2701_v26 = vpop.f32.mrf.mxu1  ;;  %v1972_v24 = vadd.f32 %v2791_v22, %v2790_v13 }
 0x114   : > { %v1997_v56 = vadd.f32 %v1996_v25, %v1995_v23  ;;  %v1969_v25 = vadd.f32 %v2789_v8, %v2788_v6 }
 0x115   : > { %v1998_v27 = vpop.f32.mrf.mxu0  ;;  %v2036_v28 = vpop.f32.mrf.mxu1  ;;  %v1199_v46 = vadd.f32 %v1972_v24, %v1134_v12 }
 0x116   : > { %v2037_v23 = vadd.f32 %v2036_v28, %v2701_v26 }
 0x117   : > { %v1999_v29 = vpop.f32.mrf.mxu0  ;;  %v2038_v30 = vpop.f32.mrf.mxu1 }
 0x119   : > { %v2001_v31 = vpop.f32.mrf.mxu0  ;;  %v2039_v32 = vpop.f32.mrf.mxu1 }
 0x11a   : > { %v2040_v9 = vadd.f32 %v2039_v32, %v2038_v30 }
 0x11b   : > { %v2002_v33 = vpop.f32.mrf.mxu0  ;;  %v2041_v34 = vpop.f32.mrf.mxu1 }
 0x11c   : > { %v2003_v63 = vadd.f32 %v2002_v33, %v2001_v31  ;;  %v1305_v33 = vadd.f32 %v2034_v4, %v1240_v0 }
 0x11d   : > { %v2004_v35 = vpop.f32.mrf.mxu0  ;;  %v2042_v36 = vpop.f32.mrf.mxu1 }
 0x11e   : > { %v2043_v20 = vadd.f32 %v2042_v36, %v2041_v34 }
 0x11f   : > { %v2005_v37 = vpop.f32.mrf.mxu0  ;;  %v2703_v38 = vpop.f32.mrf.mxu1 }
 0x120   : > { %2784 = vst [vmem:[#allocation6_spill] sm:$0xff] %v2703_v38  ;;  %v1957_v38 = vadd.f32 %v1956_v60, %v1955_v58 }
 0x121   : > { %v2705_v39 = vpop.f32.mrf.mxu0  ;;  %v2710_v44 = vpop.f32.mrf.mxu1 }
 0x122   : > { %2785 = vst [vmem:[#allocation7_spill] sm:$0xff] %v2705_v39  ;;  %2786 = vst [vmem:[#allocation8_spill] sm:$0xff] %v2710_v44  ;;  %v1963_v39 = vadd.f32 %v1962_v3, %v1961_v2  ;;  %v1178_v10 = vadd.f32 %v1957_v38, %v1113_v51  ;;  %v1183_v2 = vadd.f32 %v1960_v11, %v1118_v14 }
 0x123   : > { %v2008_v45 = vpop.f32.mrf.mxu0  ;;  %v2712_v47 = vpop.f32.mrf.mxu1  ;;  %v1126_v3 = vadd.f32 %v1926_v55, %v1775_v41  ;;  %v1129_v11 = vadd.f32 %v1929_v54, %v1775_v41 }
 0x124   : > { %2787 = vst [vmem:[#allocation9_spill] sm:$0xff] %v2712_v47  ;;  %v2000_v47 = vadd.f32 %v1999_v29, %v1998_v27  ;;  %v1186_v40 = vadd.f32 %v1963_v39, %v1121_v16  ;;  %v1975_v16 = vadd.f32 %v2699_v19, %v2697_v18  ;;  %v1243_v14 = vadd.f32 %v1997_v56, %v1178_v10 }
 0x125   : > { %v2010_v48 = vpop.f32.mrf.mxu0  ;;  %v2714_v52 = vpop.f32.mrf.mxu1  ;;  %v2006_v27 = vadd.f32 %v2005_v37, %v2004_v35  ;;  %v1191_v19 = vadd.f32 %v1966_v42, %v1126_v3  ;;  %v1194_v41 = vadd.f32 %v1969_v25, %v1129_v11 }
 0x126   : > { %v1251_v5 = vadd.f32 %v2003_v63, %v1186_v40  ;;  %v1248_v7 = vadd.f32 %v2000_v47, %v1183_v2  ;;  %v1202_v30 = vadd.f32 %v1975_v16, %v1137_v15  ;;  %v1308_v43 = vadd.f32 %v2037_v23, %v1243_v14  ;;  %v1884_v23 = vld [vmem:[%s2778_s4] ss:$0 sm:$0xff] }
 0x127   : > { %v2011_v53 = vpop.f32.mrf.mxu0  ;;  %v2050_v1 = vpop.f32.mrf.mxu1  ;;  %v1256_v47 = vadd.f32 %v2006_v27, %v1191_v19  ;;  %v2793_v37 = vld [vmem:[#allocation6_spill] sm:$0xff] }
 0x128   : > { %v1316_v18 = vadd.f32 %v2043_v20, %v1251_v5  ;;  %v2012_v32 = vadd.f32 %v2011_v53, %v2010_v48  ;;  %v1313_v36 = vadd.f32 %v2040_v9, %v1248_v7 }
 0x129   : > { %v2013_v44 = vpop.f32.mrf.mxu0  ;;  %v2051_v58 = vpop.f32.mrf.mxu1  ;;  %v2792_v38 = vld [vmem:[#allocation7_spill] sm:$0xff] }
 0x12a   : > { %v2009_v26 = vadd.f32 %v2008_v45, %v2792_v38  ;;  %v1264_v48 = vadd.f32 %v2012_v32, %v1199_v46  ;;  %v2052_v53 = vadd.f32 %v2051_v58, %v2050_v1 }
 0x12b   : > { %v2014_v60 = vpop.f32.mrf.mxu0  ;;  %v2053_v17 = vpop.f32.mrf.mxu1  ;;  %v2795_v45 = vld [vmem:[#allocation9_spill] sm:$0xff] }
 0x12c   : > { %v2015_v31 = vadd.f32 %v2014_v60, %v2013_v44  ;;  %v2794_v44 = vld [vmem:[#allocation8_spill] sm:$0xff]  ;;  %v1259_v61 = vadd.f32 %v2009_v26, %v1194_v41  ;;  %v2049_v40 = vadd.f32 %v2714_v52, %v2795_v45  ;;  %v1329_v4 = vadd.f32 %v2052_v53, %v1264_v48 }
 0x12d   : > { %v2098_v21 = vpop.f32.mrf.mxu0  ;;  %v2054_v34 = vpop.f32.mrf.mxu1  ;;  %v2046_v50 = vadd.f32 %v2794_v44, %v2793_v37 }
 0x12e   : > { %v1378_v49 = vadd.f32 %v2098_v21, %v1313_v36  ;;  %v1267_v51 = vadd.f32 %v2015_v31, %v1202_v30  ;;  %v2055_v55 = vadd.f32 %v2054_v34, %v2053_v17  ;;  %v1324_v1 = vadd.f32 %v2049_v40, %v1259_v61 }
 0x12f   : > { %v1369_v29 = vpop.f32.mrf.mxu0  ;;  %v1321_v42 = vadd.f32 %v2046_v50, %v1256_v47 }
 0x130   : > { %v1370_v28 = vadd.f32 %v1369_v29, %v1305_v33  ;;  %v1402_v60 = vmax.f32 %v1378_v49, 0.0  ;;  %v1332_v62 = vadd.f32 %v2055_v55, %v1267_v51 }
 0x131   : > { %v2099_v10 = vpop.f32.mrf.mxu0 }
 0x132   : > { %v1381_v39 = vadd.f32 %v2099_v10, %v1316_v18  ;;  %v1400_v54 = vmax.f32 %v1370_v28, 0.0 }
 0x133   : > { %v1372_v35 = vpop.f32.mrf.mxu0 }
 0x134   : > { %v1373_v57 = vadd.f32 %v1372_v35, %v1308_v43  ;;  %v1403_v63 = vmax.f32 %v1381_v39, 0.0 }
 0x135   : > { %v2102_v59 = vpop.f32.mrf.mxu0 }
 0x136   : > { %v1401_v56 = vmax.f32 %v1373_v57, 0.0  ;;  %v1409_v0 = vpack.c.bf16 %v1403_v63, %v1402_v60  ;;  %v1394_v58 = vadd.f32 %v2102_v59, %v1329_v4 }
 0x137   : > { %v1385_v2 = vpop.f32.mrf.mxu0 }
 0x138   : > { %v1408_v3 = vpack.c.bf16 %v1401_v56, %v1400_v54  ;;  %v1386_v20 = vadd.f32 %v1385_v2, %v1321_v42  ;;  %v1406_v21 = vmax.f32 %v1394_v58, 0.0 }
 0x139   : > { %v2103_v5 = vpop.f32.mrf.mxu0 }
 0x13a   : > { %v1397_v15 = vadd.f32 %v2103_v5, %v1332_v62  ;;  %2120 = vmatprep.mubr.bf16.mxu1 %v1408_v3  ;;  %v1404_v9 = vmax.f32 %v1386_v20, 0.0 }
 0x13b   : > { %v1388_v16 = vpop.f32.mrf.mxu0  ;;  %2121 = vmatmul.mubr.bf16.vlgmr.msra.gmra.mxu1 %v1409_v0 }
 0x13c   : > { %v1389_v7 = vadd.f32 %v1388_v16, %v1324_v1  ;;  %v1407_v52 = vmax.f32 %v1397_v15, 0.0 }
 0x13e   : > { %v1405_v17 = vmax.f32 %v1389_v7, 0.0  ;;  %v1411_v14 = vpack.c.bf16 %v1407_v52, %v1406_v21 }
 0x140   : > { %v1410_v11 = vpack.c.bf16 %v1405_v17, %v1404_v9 }
 0x142   : > { %2124 = vmatprep.mubr.bf16.mxu1 %v1410_v11 }
 0x143   : > { %2125 = vmatmul.mubr.bf16.gmra.mxu1 %v1411_v14 }
 0x1fb   : > { %v2122_v6 = vpop.f32.mrf.mxu1 }
 0x1fc   : > { %v1526_v8 = vadd.f32 %v2122_v6, %v1884_v23 }
 0x1fd   : > { %v1517_v25 = vpop.f32.mrf.mxu1 }
 0x1fe   : > { %1630 = vst [vmem:[%s2739_s29 + $0x10] sm:$0xff] %v1526_v8  ;;  %v1518_v12 = vadd.f32 %v1884_v23, %v1517_v25  ;;  %1560 = vrot.lane.b32.xlu1 %v1526_v8, %s2343_s18 }
 0x1ff   : > { %v2123_v13 = vpop.f32.mrf.mxu1 }
 0x200   : > { %1628 = vst [vmem:[%s2739_s29] sm:$0xff] %v1518_v12  ;;  %v1529_v22 = vadd.f32 %v2123_v13, %v1884_v23  ;;  %1556 = vrot.lane.b32.xlu0 %v1518_v12, %s2343_s18 }
 0x201   : > { %v1520_v24 = vpop.f32.mrf.mxu1 }
 0x202   : > { %1631 = vst [vmem:[%s2739_s29 + $0x18] sm:$0xff] %v1529_v22  ;;  %v1521_v27 = vadd.f32 %v1884_v23, %v1520_v24  ;;  %1562 = vrot.lane.b32.xlu1 %v1529_v22, %s2343_s18 }
 0x203   : > { %v2126_v29 = vpop.f32.mrf.mxu1 }
 0x204   : > { %1629 = vst [vmem:[%s2739_s29 + $0x8] sm:$0xff] %v1521_v27  ;;  %v1542_v31 = vadd.f32 %v2126_v29, %v1884_v23  ;;  %1558 = vrot.lane.b32.xlu0 %v1521_v27, %s2343_s18 }
 0x205   : > { %v1533_v33 = vpop.f32.mrf.mxu1 }
 0x206   : > { %1634 = vst [vmem:[%s2739_s29 + $0x30] sm:$0xff] %v1542_v31  ;;  %v1534_v18 = vadd.f32 %v1884_v23, %v1533_v33 }
 0x207   : > { %v2127_v19 = vpop.f32.mrf.mxu1 }
 0x208   : > { %1632 = vst [vmem:[%s2739_s29 + $0x20] sm:$0xff] %v1534_v18  ;;  %v1545_v30 = vadd.f32 %v2127_v19, %v1884_v23  ;;  %1564 = vrot.lane.b32.xlu0 %v1534_v18, %s2343_s18 }
 0x209   : > { %v1536_v32 = vpop.f32.mrf.mxu1 }
 0x20a   : > { %1635 = vst [vmem:[%s2739_s29 + $0x38] sm:$0xff] %v1545_v30  ;;  %v1537_v34 = vadd.f32 %v1884_v23, %v1536_v32 }
 0x20c   : > { %1633 = vst [vmem:[%s2739_s29 + $0x28] sm:$0xff] %v1537_v34  ;;  %1566 = vrot.lane.b32.xlu1 %v1537_v34, %s2343_s18  ;;  %1568 = vrot.lane.b32.xlu0 %v1542_v31, %s2343_s18 }
 0x210   : > { %1570 = vrot.lane.b32.xlu1 %v1545_v30, %s2343_s18 }
 0x270   : > { %v1561_v36 = vpop.permute.xlu1 %1560 }
 0x271   : > { %v1582_v10 = vsub.f32 %v1526_v8, %v1561_v36 }
 0x272   : > { %v1557_v38 = vpop.permute.xlu0 %1556 }
 0x273   : > { %v1590_v26 = vsub.f32 0.0, %v1582_v10  ;;  %v1580_v28 = vsub.f32 %v1518_v12, %v1557_v38 }
 0x274   : > { %v1563_v39 = vpop.permute.xlu1 %1562 }
 0x275   : > { %v1600_v43 = vmul.f32 1.442695, %v1590_v26  ;;  %v1588_v41 = vsub.f32 0.0, %v1580_v28  ;;  %v1583_v46 = vsub.f32 %v1529_v22, %v1563_v39 }
 0x276   : > { %v1559_v47 = vpop.permute.xlu0 %1558 }
 0x277   : > { %2287 = vpow2.f32 %v1600_v43  ;;  %v1596_v49 = vmul.f32 1.442695, %v1588_v41  ;;  %v1591_v35 = vsub.f32 0.0, %v1583_v46  ;;  %v1581_v37 = vsub.f32 %v1521_v27, %v1559_v47 }
 0x279   : > { %2289 = vpow2.f32 %v1596_v49  ;;  %v1602_v44 = vmul.f32 1.442695, %v1591_v35  ;;  %v1589_v50 = vsub.f32 0.0, %v1581_v37 }
 0x27a   : > { %v1565_v51 = vpop.permute.xlu0 %1564 }
 0x27b   : > { %2291 = vpow2.f32 %v1602_v44  ;;  %v1598_v55 = vmul.f32 1.442695, %v1589_v50  ;;  %v1584_v57 = vsub.f32 %v1534_v18, %v1565_v51 }
 0x27d   : > { %2293 = vpow2.f32 %v1598_v55  ;;  %v1592_v48 = vsub.f32 0.0, %v1584_v57 }
 0x27e   : > { %v1567_v53 = vpop.permute.xlu1 %1566  ;;  %v1569_v63 = vpop.permute.xlu0 %1568 }
 0x27f   : > { %v1604_v59 = vmul.f32 1.442695, %v1592_v48  ;;  %v1585_v61 = vsub.f32 %v1537_v34, %v1567_v53  ;;  %v1586_v45 = vsub.f32 %v1542_v31, %v1569_v63 }
 0x281   : > { %2295 = vpow2.f32 %v1604_v59  ;;  %v1593_v40 = vsub.f32 0.0, %v1585_v61  ;;  %v1594_v54 = vsub.f32 0.0, %v1586_v45 }
 0x282   : > { %v1571_v56 = vpop.permute.xlu1 %1570 }
 0x283   : > { %v1606_v60 = vmul.f32 1.442695, %v1593_v40  ;;  %v1608_v2 = vmul.f32 1.442695, %v1594_v54  ;;  %v1587_v3 = vsub.f32 %v1545_v30, %v1571_v56 }
 0x284   : > { %v2288_v42 = vpop.eup %2287 }
 0x285   : > { %v1614_v62 = vadd.f32 1.0, %v2288_v42  ;;  %2297 = vpow2.f32 %v1606_v60  ;;  %v1595_v0 = vsub.f32 0.0, %v1587_v3 }
 0x286   : > { %v2290_v4 = vpop.eup %2289  ;;  %2299 = vpow2.f32 %v1608_v2 }
 0x287   : > { %2301 = vrcp.f32 %v1614_v62  ;;  %v1612_v5 = vadd.f32 1.0, %v2290_v4  ;;  %v1610_v20 = vmul.f32 1.442695, %v1595_v0 }
 0x288   : > { %v2292_v15 = vpop.eup %2291 }
 0x289   : > { %2303 = vrcp.f32 %v1612_v5  ;;  %v1615_v1 = vadd.f32 1.0, %v2292_v15 }
 0x28a   : > { %v2294_v58 = vpop.eup %2293  ;;  %2305 = vpow2.f32 %v1610_v20 }
 0x28b   : > { %2307 = vrcp.f32 %v1615_v1  ;;  %v1613_v16 = vadd.f32 1.0, %v2294_v58 }
 0x28d   : > { %2309 = vrcp.f32 %v1613_v16 }
 0x28e   : > { %v2296_v7 = vpop.eup %2295 }
 0x28f   : > { %v1616_v52 = vadd.f32 1.0, %v2296_v7 }
 0x291   : > { %2311 = vrcp.f32 %v1616_v52 }
 0x292   : > { %v2298_v9 = vpop.eup %2297 }
 0x293   : > { %v2300_v17 = vpop.eup %2299  ;;  %v1617_v21 = vadd.f32 1.0, %v2298_v9 }
 0x294   : > { %v2302_v11 = vpop.eup %2301  ;;  %v1618_v14 = vadd.f32 1.0, %v2300_v17 }
 0x295   : > { %2313 = vrcp.f32 %v1617_v21  ;;  %1648 = vrot.lane.b32.xlu0 %v2302_v11, %s2344_s30 }
 0x296   : > { %v2304_v23 = vpop.eup %2303  ;;  %2315 = vrcp.f32 %v1618_v14 }
 0x297   : > { %v2306_v6 = vpop.eup %2305 }
 0x298   : > { %v2308_v8 = vpop.eup %2307  ;;  %v1619_v25 = vadd.f32 1.0, %v2306_v6 }
 0x299   : > { %1650 = vrot.lane.b32.xlu1 %v2308_v8, %s2344_s30  ;;  %1644 = vrot.lane.b32.xlu0 %v2304_v23, %s2344_s30 }
 0x29a   : > { %2317 = vrcp.f32 %v1619_v25  ;;  %v2310_v12 = vpop.eup %2309 }
 0x29d   : > { %1646 = vrot.lane.b32.xlu1 %v2310_v12, %s2344_s30 }
 0x29e   : > { %v2312_v13 = vpop.eup %2311 }
 0x29f   : > { %1652 = vrot.lane.b32.xlu0 %v2312_v13, %s2344_s30 }
 0x2a2   : > { %v2314_v22 = vpop.eup %2313 }
 0x2a3   : > { %v2316_v24 = vpop.eup %2315  ;;  %1654 = vrot.lane.b32.xlu1 %v2314_v22, %s2344_s30 }
 0x2a4   : > { %1656 = vrot.lane.b32.xlu0 %v2316_v24, %s2344_s30 }
 0x2a7   : > { %v2318_v27 = vpop.eup %2317 }
 0x2a8   : > { %1658 = vrot.lane.b32.xlu1 %v2318_v27, %s2344_s30 }
 0x307   : > { %v1649_v29 = vpop.permute.xlu0 %1648 }
 0x308   : > { %1671 = vst.msk [vmem:[%s2739_s29 + $0x10] sm:$0xff] %vm1668_vm0, %v1649_v29 }
 0x30b   : > { %v1651_v31 = vpop.permute.xlu1 %1650  ;;  %v1645_v33 = vpop.permute.xlu0 %1644 }
 0x30c   : > { %1672 = vst.msk [vmem:[%s2739_s29 + $0x18] sm:$0xff] %vm1668_vm0, %v1651_v31  ;;  %1669 = vst.msk [vmem:[%s2739_s29] sm:$0xff] %vm1668_vm0, %v1645_v33 }
 0x30f   : > { %v1647_v18 = vpop.permute.xlu1 %1646 }
 0x310   : > { %1670 = vst.msk [vmem:[%s2739_s29 + $0x8] sm:$0xff] %vm1668_vm0, %v1647_v18 }
 0x311   : > { %v1653_v19 = vpop.permute.xlu0 %1652 }
 0x312   : > { %1673 = vst.msk [vmem:[%s2739_s29 + $0x20] sm:$0xff] %vm1668_vm0, %v1653_v19 }
 0x315   : > { %v1655_v30 = vpop.permute.xlu1 %1654 }
 0x316   : > { %1674 = vst.msk [vmem:[%s2739_s29 + $0x28] sm:$0xff] %vm1668_vm0, %v1655_v30  ;;  %v1657_v32 = vpop.permute.xlu0 %1656 }
 0x317   : > { %1675 = vst.msk [vmem:[%s2739_s29 + $0x30] sm:$0xff] %vm1668_vm0, %v1657_v32 }
 0x31a   : > { %v1659_v34 = vpop.permute.xlu1 %1658 }
 0x31b   : > { %1676 = vst.msk [vmem:[%s2739_s29 + $0x38] sm:$0xff] %vm1668_vm0, %v1659_v34 }
 0x31c PF: > { %s15_s20 = sadd.s32 1, %s2341_s20   ;;  %s2796_s18 = smov %s2337_s19 }
 0x31d   : > { %p12_p5 = scmp.ge.s32.totalorder %s15_s20, 4   ;;  %s2797_s19 = smov %s2799_s21 }
 0x31f   :  { %14 = sbr.rel (!%p12_p5) target bundleno = 2 (0x2), region = 70 }

</bundles_post_ra>
